<compile_context>
chip_gen: v5e
topology: v5e:2x2
jax: 0.10.0
libtpu: 0.0.40
codegen_flags: <defaults>
</compile_context>

<pallas_src>
import functools

import jax
import jax.numpy as jnp
from jax.experimental import pallas as pl
from jax.experimental.pallas import tpu as pltpu


def _round_up(a, b):
    return (a + b - 1) // b * b


def _vmem_cap():
    """Generation-aware VMEM budget (bytes); safe fallback for v7x."""
    try:
        return (int(pltpu.get_tpu_info().vmem_capacity_bytes) * 3) // 4
    except Exception:
        return 48 * 1024 * 1024


def _pick_tile_n(n, ip, hp, zp, vmem_cap):
    """Largest batch tile whose streamed buffers fit beside the resident weights."""
    # Resident, single-buffered (pl.Buffered(1)) bf16 weights + f32 row vectors.
    resident = 2 * (ip * hp + hp * hp + hp * 2 * zp)
    resident += 4 * (6 * hp + 4 * zp)
    budget = vmem_cap - resident - (2 << 20)  # scratch / headroom
    # Streamed per batch row: bf16 x tile (double-buffered) + f32 fused output
    # tile (double-buffered).
    per_row = 2 * ip * 2 + 2 * (2 * zp) * 4
    tile = 16
    for cand in (1024, 512, 256, 128, 64, 32, 16):
        if cand * per_row <= budget:
            tile = cand
            break
    return max(16, min(tile, _round_up(n, 16)))


# --------------------------------------------------------------------------
# Phase 0: per-feature sum / sum-of-squares of h1 = x @ W1 + b1.
# Grid = (core_split, tiles_per_core); each core owns one (8, hp) partial.
# --------------------------------------------------------------------------
def _moments_kernel(x_ref, w1_ref, b1_ref, sum_ref, sq_ref):
    t = pl.program_id(1)

    @pl.when(t == 0)
    def _init():
        sum_ref[...] = jnp.zeros_like(sum_ref)
        sq_ref[...] = jnp.zeros_like(sq_ref)

    # bf16 MXU matmul, f32 accumulation.
    h = jnp.dot(x_ref[...], w1_ref[...],
                preferred_element_type=jnp.float32) + b1_ref[...]

    # Partial-reduce to 8 sublanes (pure VPU adds); final cross-sublane /
    # cross-core reduction happens in the tiny XLA glue.
    tn, hp = h.shape
    hs = h.reshape(tn // 8, 8, hp)
    sum_ref[...] += jnp.sum(hs, axis=0)
    sq_ref[...] += jnp.sum(hs * hs, axis=0)


# --------------------------------------------------------------------------
# Phase 1: full forward per batch tile (BN folded into per-feature affine).
# Single merged (tile_n, 2*zp) output slab: [:, :zp]=Z, [:, zp:]=logits.
# --------------------------------------------------------------------------
def _pro_dsc_kernel(x_ref, w1_ref, b1_ref, scale_ref, shift_ref,
                    w2_ref, b2_ref, wh_ref, bh_ref, out_ref, *, zp):
    # Linear1 (recomputed; cheaper than round-tripping h1 through HBM).
    h = jnp.dot(x_ref[...], w1_ref[...],
                preferred_element_type=jnp.float32) + b1_ref[...]

    # BatchNorm1d (training-mode batch stats) as per-feature affine, then ReLU.
    h = jnp.maximum(h * scale_ref[...] + shift_ref[...], 0.0)

    # Linear2 + ReLU.
    h = jnp.dot(h.astype(jnp.bfloat16), w2_ref[...],
                preferred_element_type=jnp.float32) + b2_ref[...]
    h = jnp.maximum(h, 0.0)

    # Fused subspace + cluster heads: one MXU pass to (tile_n, 2*zp).
    heads = jnp.dot(h.astype(jnp.bfloat16), wh_ref[...],
                    preferred_element_type=jnp.float32) + bh_ref[...]
    z = heads[:, :zp]          # lane-aligned split (zp multiple of 128)
    lg = heads[:, zp:]

    # F.normalize(p=2, dim=1, eps=1e-12) == x * rsqrt(max(sum(x^2), eps^2));
    # padded columns are exactly zero so sums equal the real-z_dim sums.
    z_inv = jax.lax.rsqrt(jnp.maximum(jnp.sum(z * z, axis=1, keepdims=True),
                                      1e-24))
    l_inv = jax.lax.rsqrt(jnp.maximum(jnp.sum(lg * lg, axis=1, keepdims=True),
                                      1e-24))
    out_ref[:, :zp] = (z * z_inv).astype(out_ref.dtype)
    out_ref[:, zp:] = (lg * l_inv).astype(out_ref.dtype)


# --------------------------------------------------------------------------
# One-time parameter prep (hoisted out of the per-call path): pad to 128-lane
# multiples, fuse the two heads, cast matmul operands to bf16.
# --------------------------------------------------------------------------
def prepare_params(params):
    input_dim, hidden = params["w1"].shape
    z_dim = params["ws"].shape[1]
    ip = _round_up(input_dim, 128)
    hp = _round_up(hidden, 128)
    zp = _round_up(z_dim, 128)

    w1 = jnp.pad(params["w1"], ((0, ip - input_dim), (0, hp - hidden))
                 ).astype(jnp.bfloat16)
    b1 = jnp.pad(params["b1"], (0, hp - hidden)).reshape(1, hp).astype(jnp.float32)
    w2 = jnp.pad(params["w2"], ((0, hp - hidden), (0, hp - hidden))
                 ).astype(jnp.bfloat16)
    b2 = jnp.pad(params["b2"], (0, hp - hidden)).reshape(1, hp).astype(jnp.float32)
    gamma = jnp.pad(params["gamma"], (0, hp - hidden)).reshape(1, hp).astype(jnp.float32)
    beta = jnp.pad(params["beta"], (0, hp - hidden)).reshape(1, hp).astype(jnp.float32)

    # Fused heads: columns [0:z_dim] = subspace, [zp:zp+z_dim] = cluster.
    wh = jnp.zeros((hp, 2 * zp), jnp.float32)
    wh = wh.at[:hidden, :z_dim].set(params["ws"])
    wh = wh.at[:hidden, zp:zp + z_dim].set(params["wc"]).astype(jnp.bfloat16)
    bh = jnp.zeros((1, 2 * zp), jnp.float32)
    bh = bh.at[0, :z_dim].set(params["bs"])
    bh = bh.at[0, zp:zp + z_dim].set(params["bc"])

    return dict(w1=w1, b1=b1, w2=w2, b2=b2, gamma=gamma, beta=beta, wh=wh, bh=bh)


# --------------------------------------------------------------------------
# Forward: two pallas_calls + tiny (1, hp) XLA glue in between.
# --------------------------------------------------------------------------
@functools.partial(jax.jit, static_argnames=("z_dim",))
def pro_dsc_forward(x, prep, z_dim):
    n, input_dim = x.shape
    w1, b1, w2, b2 = prep["w1"], prep["b1"], prep["w2"], prep["b2"]
    gamma, beta, wh, bh = prep["gamma"], prep["beta"], prep["wh"], prep["bh"]
    ip, hp = w1.shape
    zp = wh.shape[1] // 2

    vmem_cap = _vmem_cap()
    tile_n = _pick_tile_n(n, ip, hp, zp, vmem_cap)

    # Split the phase-0 tiles across (up to) two TensorCores when there is
    # more than one tile of work.
    num_tiles0 = _round_up(n, tile_n) // tile_n
    split = 2 if num_tiles0 >= 2 else 1
    tiles_per_core = -(-num_tiles0 // split)
    num_tiles = split * tiles_per_core
    n_pad = num_tiles * tile_n
    pad_rows = n_pad - n

    xp = jnp.pad(x, ((0, pad_rows), (0, ip - input_dim))).astype(jnp.bfloat16)

    resident1 = dict(pipeline_mode=pl.Buffered(1))  # never re-fetched blocks

    # ---- phase 0: batch moments of h1 (per-core partials, no row masking) ----
    psum, psq = pl.pallas_call(
        _moments_kernel,
        out_shape=(jax.ShapeDtypeStruct((split * 8, hp), jnp.float32),
                   jax.ShapeDtypeStruct((split * 8, hp), jnp.float32)),
        grid_spec=pltpu.PrefetchScalarGridSpec(
            num_scalar_prefetch=0,
            grid=(split, tiles_per_core),
            in_specs=[
                pl.BlockSpec((tile_n, ip),
                             lambda c, t: (c * tiles_per_core + t, 0)),
                pl.BlockSpec((ip, hp), lambda c, t: (0, 0), **resident1),
                pl.BlockSpec((1, hp), lambda c, t: (0, 0), **resident1),
            ],
            out_specs=(pl.BlockSpec((8, hp), lambda c, t: (c, 0)),
                       pl.BlockSpec((8, hp), lambda c, t: (c, 0)))),
        compiler_params=pltpu.CompilerParams(
            dimension_semantics=("parallel", "arbitrary"),
            vmem_limit_bytes=vmem_cap),
    )(xp, w1, b1)

    # Tiny XLA glue: combine per-core partials, subtract the exact
    # contribution of the padded (all-zero) rows (h1 == b1 there), fold BN
    # (biased variance, eps=1e-5) into a per-feature affine.
    # TODO(synk): one-pass E[x^2]-E[x]^2 can cancel when |mean| >> std; switch
    # to shifted moments if production inputs are far from zero-mean.
    ssum = jnp.sum(psum, axis=0, keepdims=True) - pad_rows * b1
    ssq = jnp.sum(psq, axis=0, keepdims=True) - pad_rows * (b1 * b1)
    mean = ssum / n
    var = jnp.maximum(ssq / n - mean * mean, 0.0)
    inv_std = jax.lax.rsqrt(var + 1e-5)
    scale = gamma * inv_std
    shift = beta - mean * scale

    # ---- phase 1: full forward per tile, single merged output slab ----
    out = pl.pallas_call(
        functools.partial(_pro_dsc_kernel, zp=zp),
        out_shape=jax.ShapeDtypeStruct((n_pad, 2 * zp), jnp.float32),
        grid_spec=pltpu.PrefetchScalarGridSpec(
            num_scalar_prefetch=0,
            grid=(num_tiles,),
            in_specs=[
                pl.BlockSpec((tile_n, ip), lambda t: (t, 0)),             # x
                pl.BlockSpec((ip, hp), lambda t: (0, 0), **resident1),    # w1
                pl.BlockSpec((1, hp), lambda t: (0, 0), **resident1),     # b1
                pl.BlockSpec((1, hp), lambda t: (0, 0), **resident1),     # scale
                pl.BlockSpec((1, hp), lambda t: (0, 0), **resident1),     # shift
                pl.BlockSpec((hp, hp), lambda t: (0, 0), **resident1),    # w2
                pl.BlockSpec((1, hp), lambda t: (0, 0), **resident1),     # b2
                pl.BlockSpec((hp, 2 * zp), lambda t: (0, 0), **resident1),  # heads W
                pl.BlockSpec((1, 2 * zp), lambda t: (0, 0), **resident1),   # heads b
            ],
            out_specs=pl.BlockSpec((tile_n, 2 * zp), lambda t: (t, 0))),
        compiler_params=pltpu.CompilerParams(
            dimension_semantics=("parallel",),
            vmem_limit_bytes=vmem_cap),
    )(xp, w1, b1, scale, shift, w2, b2, wh, bh)

    z = out[:n, :z_dim]
    logits = out[:n, zp:zp + z_dim]
    return z, logits


# --------------------------------------------------------------------------
# Pure-JAX f32 reference (mirrors the PyTorch module) and param init.
# --------------------------------------------------------------------------
def pro_dsc_reference(x, p):
    h = x @ p["w1"] + p["b1"]
    mean = h.mean(axis=0, keepdims=True)
    var = ((h - mean) ** 2).mean(axis=0, keepdims=True)          # biased var
    h = (h - mean) * jax.lax.rsqrt(var + 1e-5) * p["gamma"] + p["beta"]
    h = jnp.maximum(h, 0.0)
    h = jnp.maximum(h @ p["w2"] + p["b2"], 0.0)
    z = h @ p["ws"] + p["bs"]
    lg = h @ p["wc"] + p["bc"]
    z = z / jnp.maximum(jnp.linalg.norm(z, axis=1, keepdims=True), 1e-12)
    lg = lg / jnp.maximum(jnp.linalg.norm(lg, axis=1, keepdims=True), 1e-12)
    return z, lg


def init_params(key, input_dim, hidden_dim, z_dim):
    ks = jax.random.split(key, 4)

    def lin(k, fan_in, fan_out):
        bound = 1.0 / jnp.sqrt(fan_in)
        kw, kb = jax.random.split(k)
        w = jax.random.uniform(kw, (fan_in, fan_out), jnp.float32, -bound, bound)
        b = jax.random.uniform(kb, (fan_out,), jnp.float32, -bound, bound)
        return w, b

    w1, b1 = lin(ks[0], input_dim, hidden_dim)
    w2, b2 = lin(ks[1], hidden_dim, hidden_dim)
    ws, bs = lin(ks[2], hidden_dim, z_dim)
    wc, bc = lin(ks[3], hidden_dim, z_dim)
    gamma = jnp.ones((hidden_dim,), jnp.float32)
    beta = jnp.zeros((hidden_dim,), jnp.float32)
    return dict(w1=w1, b1=b1, gamma=gamma, beta=beta,
                w2=w2, b2=b2, ws=ws, bs=bs, wc=wc, bc=bc)


if __name__ == "__main__":
    key = jax.random.PRNGKey(0)
    k_x, k_p = jax.random.split(key)

    batch, input_dim, hidden_dim, z_dim = 8, 32, 32, 16
    x = jax.random.normal(k_x, (batch, input_dim), jnp.float32)
    params = init_params(k_p, input_dim, hidden_dim, z_dim)

    prep = prepare_params(params)            # one-time pad / cast / head fusion
    z, logits = pro_dsc_forward(x, prep, z_dim=z_dim)
    jax.block_until_ready((z, logits))

    assert z.shape == (batch, z_dim) and logits.shape == (batch, z_dim)
    # rows must be unit-norm after F.normalize
    assert jnp.allclose(jnp.linalg.norm(z, axis=1), 1.0, atol=1e-3)
    assert jnp.allclose(jnp.linalg.norm(logits, axis=1), 1.0, atol=1e-3)

    # loose tolerance vs f32 reference (kernel uses bf16 matmul operands)
    z_ref, l_ref = pro_dsc_reference(x, params)
    assert jnp.max(jnp.abs(z - z_ref)) < 0.1
    assert jnp.max(jnp.abs(logits - l_ref)) < 0.1

    print("KERNEL_OK")
</pallas_src>

<mosaic_0001>
module attributes {stable_mosaic.version = 11 : i64} {
  func.func @_moments_kernel(%arg0: i32, %arg1: i32, %arg2: memref<16x128xbf16, #tpu.memory_space<vmem>>, %arg3: memref<128x128xbf16, #tpu.memory_space<vmem>>, %arg4: memref<1x128xf32, #tpu.memory_space<vmem>>, %arg5: memref<8x128xf32, #tpu.memory_space<vmem>>, %arg6: memref<8x128xf32, #tpu.memory_space<vmem>>) attributes {dimension_semantics = [#tpu.dimension_semantics<parallel>, #tpu.dimension_semantics<arbitrary>], iteration_bounds = array<i64: 1, 1>, scalar_prefetch = 0 : i64, scratch_operands = 0 : i64, tpu.core_type = #tpu.core_type<tc>, window_params = [{transform_indices = @transform_0, window_bounds = array<i64: 16, 128>}, {pipeline_mode = #tpu.pipeline_mode<synchronous>, transform_indices = @transform_1, window_bounds = array<i64: 128, 128>}, {pipeline_mode = #tpu.pipeline_mode<synchronous>, transform_indices = @transform_2, window_bounds = array<i64: 1, 128>}, {transform_indices = @transform_3, window_bounds = array<i64: 8, 128>}, {transform_indices = @transform_4, window_bounds = array<i64: 8, 128>}]} {
    %c0_i32 = arith.constant 0 : i32
    %0 = arith.cmpi eq, %arg1, %c0_i32 : i32
    %1 = arith.extui %0 : i1 to i32
    %c0_i32_0 = arith.constant 0 : i32
    %2 = arith.cmpi ne, %1, %c0_i32_0 : i32
    scf.if %2 {
      %cst_16 = arith.constant 0.000000e+00 : f32
      %19 = vector.broadcast %cst_16 : f32 to vector<8x128xf32>
      %c0_17 = arith.constant 0 : index
      %c0_18 = arith.constant 0 : index
      %20 = vector.load %arg5[%c0_17, %c0_18] : memref<8x128xf32, #tpu.memory_space<vmem>>, vector<8x128xf32>
      tpu.vector_store %arg5[%c0_17, %c0_18], %19 {strides = array<i32>} : memref<8x128xf32, #tpu.memory_space<vmem>>, vector<8x128xf32>,
      %cst_19 = arith.constant 0.000000e+00 : f32
      %21 = vector.broadcast %cst_19 : f32 to vector<8x128xf32>
      %c0_20 = arith.constant 0 : index
      %c0_21 = arith.constant 0 : index
      %22 = vector.load %arg6[%c0_20, %c0_21] : memref<8x128xf32, #tpu.memory_space<vmem>>, vector<8x128xf32>
      tpu.vector_store %arg6[%c0_20, %c0_21], %21 {strides = array<i32>} : memref<8x128xf32, #tpu.memory_space<vmem>>, vector<8x128xf32>,
    } else {
    }
    %c0 = arith.constant 0 : index
    %c0_1 = arith.constant 0 : index
    %3 = vector.load %arg2[%c0, %c0_1] : memref<16x128xbf16, #tpu.memory_space<vmem>>, vector<16x128xbf16>
    %c0_2 = arith.constant 0 : index
    %c0_3 = arith.constant 0 : index
    %4 = vector.load %arg3[%c0_2, %c0_3] : memref<128x128xbf16, #tpu.memory_space<vmem>>, vector<128x128xbf16>
    %cst = arith.constant dense<0.000000e+00> : vector<16x128xf32>
    %5 = tpu.matmul %3, %4, %cst {dimension_numbers = #tpu.dot_dimension_numbers<[1], [0], [0], [1], [0, 0, 1, 1], [], []>} : vector<16x128xbf16>, vector<128x128xbf16>, vector<16x128xf32> -> vector<16x128xf32>
    %c0_4 = arith.constant 0 : index
    %c0_5 = arith.constant 0 : index
    %6 = vector.load %arg4[%c0_4, %c0_5] : memref<1x128xf32, #tpu.memory_space<vmem>>, vector<1x128xf32>
    %7 = vector.broadcast %6 : vector<1x128xf32> to vector<16x128xf32>
    %8 = arith.addf %5, %7 : vector<16x128xf32>
    %9 = vector.shape_cast %8 : vector<16x128xf32> to vector<2x8x128xf32>
    %c0_6 = arith.constant 0 : index
    %c0_7 = arith.constant 0 : index
    %10 = vector.load %arg5[%c0_6, %c0_7] : memref<8x128xf32, #tpu.memory_space<vmem>>, vector<8x128xf32>
    %cst_8 = arith.constant dense<0.000000e+00> : vector<8x128xf32>
    %11 = vector.multi_reduction <add>, %9, %cst_8 [0] : vector<2x8x128xf32> to vector<8x128xf32>
    %12 = arith.addf %10, %11 : vector<8x128xf32>
    %c0_9 = arith.constant 0 : index
    %c0_10 = arith.constant 0 : index
    %13 = vector.load %arg5[%c0_9, %c0_10] : memref<8x128xf32, #tpu.memory_space<vmem>>, vector<8x128xf32>
    tpu.vector_store %arg5[%c0_9, %c0_10], %12 {strides = array<i32>} : memref<8x128xf32, #tpu.memory_space<vmem>>, vector<8x128xf32>,
    %c0_11 = arith.constant 0 : index
    %c0_12 = arith.constant 0 : index
    %14 = vector.load %arg6[%c0_11, %c0_12] : memref<8x128xf32, #tpu.memory_space<vmem>>, vector<8x128xf32>
    %15 = arith.mulf %9, %9 : vector<2x8x128xf32>
    %cst_13 = arith.constant dense<0.000000e+00> : vector<8x128xf32>
    %16 = vector.multi_reduction <add>, %15, %cst_13 [0] : vector<2x8x128xf32> to vector<8x128xf32>
    %17 = arith.addf %14, %16 : vector<8x128xf32>
    %c0_14 = arith.constant 0 : index
    %c0_15 = arith.constant 0 : index
    %18 = vector.load %arg6[%c0_14, %c0_15] : memref<8x128xf32, #tpu.memory_space<vmem>>, vector<8x128xf32>
    tpu.vector_store %arg6[%c0_14, %c0_15], %17 {strides = array<i32>} : memref<8x128xf32, #tpu.memory_space<vmem>>, vector<8x128xf32>,
    return
  }
  func.func @transform_0(%arg0: i32, %arg1: i32) -> (i32, i32) {
    %c1_i32 = arith.constant 1 : i32
    %0 = arith.muli %arg0, %c1_i32 : i32
    %1 = arith.addi %0, %arg1 : i32
    %c0_i32 = arith.constant 0 : i32
    %c0_i32_0 = arith.constant 0 : i32
    return %1, %c0_i32 : i32, i32
  }
  func.func @transform_1(%arg0: i32, %arg1: i32) -> (i32, i32) {
    %c0_i32 = arith.constant 0 : i32
    %c0_i32_0 = arith.constant 0 : i32
    %c0_i32_1 = arith.constant 0 : i32
    return %c0_i32, %c0_i32_0 : i32, i32
  }
  func.func @transform_2(%arg0: i32, %arg1: i32) -> (i32, i32) {
    %c0_i32 = arith.constant 0 : i32
    %c0_i32_0 = arith.constant 0 : i32
    %c0_i32_1 = arith.constant 0 : i32
    return %c0_i32, %c0_i32_0 : i32, i32
  }
  func.func @transform_3(%arg0: i32, %arg1: i32) -> (i32, i32) {
    %c0_i32 = arith.constant 0 : i32
    %c0_i32_0 = arith.constant 0 : i32
    return %arg0, %c0_i32 : i32, i32
  }
  func.func @transform_4(%arg0: i32, %arg1: i32) -> (i32, i32) {
    %c0_i32 = arith.constant 0 : i32
    %c0_i32_0 = arith.constant 0 : i32
    return %arg0, %c0_i32 : i32, i32
  }
}

module attributes {stable_mosaic.version = 11 : i64} {
  func.func @_pro_dsc_kernel(%arg0: i32, %arg1: memref<16x128xbf16, #tpu.memory_space<vmem>>, %arg2: memref<128x128xbf16, #tpu.memory_space<vmem>>, %arg3: memref<1x128xf32, #tpu.memory_space<vmem>>, %arg4: memref<1x128xf32, #tpu.memory_space<vmem>>, %arg5: memref<1x128xf32, #tpu.memory_space<vmem>>, %arg6: memref<128x128xbf16, #tpu.memory_space<vmem>>, %arg7: memref<1x128xf32, #tpu.memory_space<vmem>>, %arg8: memref<128x256xbf16, #tpu.memory_space<vmem>>, %arg9: memref<1x256xf32, #tpu.memory_space<vmem>>, %arg10: memref<16x256xf32, #tpu.memory_space<vmem>>) attributes {dimension_semantics = [#tpu.dimension_semantics<parallel>], iteration_bounds = array<i64: 1>, scalar_prefetch = 0 : i64, scratch_operands = 0 : i64, tpu.core_type = #tpu.core_type<tc>, window_params = [{transform_indices = @transform_0, window_bounds = array<i64: 16, 128>}, {pipeline_mode = #tpu.pipeline_mode<synchronous>, transform_indices = @transform_1, window_bounds = array<i64: 128, 128>}, {pipeline_mode = #tpu.pipeline_mode<synchronous>, transform_indices = @transform_2, window_bounds = array<i64: 1, 128>}, {pipeline_mode = #tpu.pipeline_mode<synchronous>, transform_indices = @transform_3, window_bounds = array<i64: 1, 128>}, {pipeline_mode = #tpu.pipeline_mode<synchronous>, transform_indices = @transform_4, window_bounds = array<i64: 1, 128>}, {pipeline_mode = #tpu.pipeline_mode<synchronous>, transform_indices = @transform_5, window_bounds = array<i64: 128, 128>}, {pipeline_mode = #tpu.pipeline_mode<synchronous>, transform_indices = @transform_6, window_bounds = array<i64: 1, 128>}, {pipeline_mode = #tpu.pipeline_mode<synchronous>, transform_indices = @transform_7, window_bounds = array<i64: 128, 256>}, {pipeline_mode = #tpu.pipeline_mode<synchronous>, transform_indices = @transform_8, window_bounds = array<i64: 1, 256>}, {transform_indices = @transform_9, window_bounds = array<i64: 16, 256>}]} {
    %c0 = arith.constant 0 : index
    %c0_0 = arith.constant 0 : index
    %0 = vector.load %arg1[%c0, %c0_0] : memref<16x128xbf16, #tpu.memory_space<vmem>>, vector<16x128xbf16>
    %c0_1 = arith.constant 0 : index
    %c0_2 = arith.constant 0 : index
    %1 = vector.load %arg2[%c0_1, %c0_2] : memref<128x128xbf16, #tpu.memory_space<vmem>>, vector<128x128xbf16>
    %cst = arith.constant dense<0.000000e+00> : vector<16x128xf32>
    %2 = tpu.matmul %0, %1, %cst {dimension_numbers = #tpu.dot_dimension_numbers<[1], [0], [0], [1], [0, 0, 1, 1], [], []>} : vector<16x128xbf16>, vector<128x128xbf16>, vector<16x128xf32> -> vector<16x128xf32>
    %c0_3 = arith.constant 0 : index
    %c0_4 = arith.constant 0 : index
    %3 = vector.load %arg3[%c0_3, %c0_4] : memref<1x128xf32, #tpu.memory_space<vmem>>, vector<1x128xf32>
    %4 = vector.broadcast %3 : vector<1x128xf32> to vector<16x128xf32>
    %5 = arith.addf %2, %4 : vector<16x128xf32>
    %c0_5 = arith.constant 0 : index
    %c0_6 = arith.constant 0 : index
    %6 = vector.load %arg4[%c0_5, %c0_6] : memref<1x128xf32, #tpu.memory_space<vmem>>, vector<1x128xf32>
    %7 = vector.broadcast %6 : vector<1x128xf32> to vector<16x128xf32>
    %8 = arith.mulf %5, %7 : vector<16x128xf32>
    %c0_7 = arith.constant 0 : index
    %c0_8 = arith.constant 0 : index
    %9 = vector.load %arg5[%c0_7, %c0_8] : memref<1x128xf32, #tpu.memory_space<vmem>>, vector<1x128xf32>
    %10 = vector.broadcast %9 : vector<1x128xf32> to vector<16x128xf32>
    %11 = arith.addf %8, %10 : vector<16x128xf32>
    %cst_9 = arith.constant 0.000000e+00 : f32
    %12 = vector.broadcast %cst_9 : f32 to vector<16x128xf32>
    %13 = arith.maximumf %11, %12 : vector<16x128xf32>
    %14 = arith.truncf %13 : vector<16x128xf32> to vector<16x128xbf16>
    %c0_10 = arith.constant 0 : index
    %c0_11 = arith.constant 0 : index
    %15 = vector.load %arg6[%c0_10, %c0_11] : memref<128x128xbf16, #tpu.memory_space<vmem>>, vector<128x128xbf16>
    %cst_12 = arith.constant dense<0.000000e+00> : vector<16x128xf32>
    %16 = tpu.matmul %14, %15, %cst_12 {dimension_numbers = #tpu.dot_dimension_numbers<[1], [0], [0], [1], [0, 0, 1, 1], [], []>} : vector<16x128xbf16>, vector<128x128xbf16>, vector<16x128xf32> -> vector<16x128xf32>
    %c0_13 = arith.constant 0 : index
    %c0_14 = arith.constant 0 : index
    %17 = vector.load %arg7[%c0_13, %c0_14] : memref<1x128xf32, #tpu.memory_space<vmem>>, vector<1x128xf32>
    %18 = vector.broadcast %17 : vector<1x128xf32> to vector<16x128xf32>
    %19 = arith.addf %16, %18 : vector<16x128xf32>
    %cst_15 = arith.constant 0.000000e+00 : f32
    %20 = vector.broadcast %cst_15 : f32 to vector<16x128xf32>
    %21 = arith.maximumf %19, %20 : vector<16x128xf32>
    %22 = arith.truncf %21 : vector<16x128xf32> to vector<16x128xbf16>
    %c0_16 = arith.constant 0 : index
    %c0_17 = arith.constant 0 : index
    %23 = vector.load %arg8[%c0_16, %c0_17] : memref<128x256xbf16, #tpu.memory_space<vmem>>, vector<128x256xbf16>
    %cst_18 = arith.constant dense<0.000000e+00> : vector<16x256xf32>
    %24 = tpu.matmul %22, %23, %cst_18 {dimension_numbers = #tpu.dot_dimension_numbers<[1], [0], [0], [1], [0, 0, 1, 1], [], []>} : vector<16x128xbf16>, vector<128x256xbf16>, vector<16x256xf32> -> vector<16x256xf32>
    %c0_19 = arith.constant 0 : index
    %c0_20 = arith.constant 0 : index
    %25 = vector.load %arg9[%c0_19, %c0_20] : memref<1x256xf32, #tpu.memory_space<vmem>>, vector<1x256xf32>
    %26 = vector.broadcast %25 : vector<1x256xf32> to vector<16x256xf32>
    %27 = arith.addf %24, %26 : vector<16x256xf32>
    %28 = vector.extract_strided_slice %27 {offsets = [0, 0], sizes = [16, 128], strides = [1, 1]} : vector<16x256xf32> to vector<16x128xf32>
    %29 = vector.extract_strided_slice %27 {offsets = [0, 128], sizes = [16, 128], strides = [1, 1]} : vector<16x256xf32> to vector<16x128xf32>
    %30 = arith.mulf %28, %28 : vector<16x128xf32>
    %cst_21 = arith.constant dense<0.000000e+00> : vector<16xf32>
    %31 = vector.multi_reduction <add>, %30, %cst_21 [1] : vector<16x128xf32> to vector<16xf32>
    %32 = vector.shape_cast %31 : vector<16xf32> to vector<16x1xf32>
    %cst_22 = arith.constant 1.000000e-24 : f32
    %33 = vector.broadcast %cst_22 : f32 to vector<16x1xf32>
    %34 = arith.maximumf %32, %33 : vector<16x1xf32>
    %35 = math.rsqrt %34 : vector<16x1xf32>
    %36 = arith.mulf %29, %29 : vector<16x128xf32>
    %cst_23 = arith.constant dense<0.000000e+00> : vector<16xf32>
    %37 = vector.multi_reduction <add>, %36, %cst_23 [1] : vector<16x128xf32> to vector<16xf32>
    %38 = vector.shape_cast %37 : vector<16xf32> to vector<16x1xf32>
    %cst_24 = arith.constant 1.000000e-24 : f32
    %39 = vector.broadcast %cst_24 : f32 to vector<16x1xf32>
    %40 = arith.maximumf %38, %39 : vector<16x1xf32>
    %41 = math.rsqrt %40 : vector<16x1xf32>
    %42 = vector.broadcast %35 : vector<16x1xf32> to vector<16x128xf32>
    %43 = arith.mulf %28, %42 : vector<16x128xf32>
    %c0_25 = arith.constant 0 : index
    %c0_26 = arith.constant 0 : index
    %44 = vector.load %arg10[%c0_25, %c0_26] : memref<16x256xf32, #tpu.memory_space<vmem>>, vector<16x128xf32>
    tpu.vector_store %arg10[%c0_25, %c0_26], %43 {strides = array<i32>} : memref<16x256xf32, #tpu.memory_space<vmem>>, vector<16x128xf32>,
    %45 = vector.broadcast %41 : vector<16x1xf32> to vector<16x128xf32>
    %46 = arith.mulf %29, %45 : vector<16x128xf32>
    %c0_27 = arith.constant 0 : index
    %c128 = arith.constant 128 : index
    %47 = vector.load %arg10[%c0_27, %c128] : memref<16x256xf32, #tpu.memory_space<vmem>>, vector<16x128xf32>
    tpu.vector_store %arg10[%c0_27, %c128], %46 {strides = array<i32>} : memref<16x256xf32, #tpu.memory_space<vmem>>, vector<16x128xf32>,
    return
  }
  func.func @transform_0(%arg0: i32) -> (i32, i32) {
    %c0_i32 = arith.constant 0 : i32
    %c0_i32_0 = arith.constant 0 : i32
    return %arg0, %c0_i32 : i32, i32
  }
  func.func @transform_1(%arg0: i32) -> (i32, i32) {
    %c0_i32 = arith.constant 0 : i32
    %c0_i32_0 = arith.constant 0 : i32
    %c0_i32_1 = arith.constant 0 : i32
    return %c0_i32, %c0_i32_0 : i32, i32
  }
  func.func @transform_2(%arg0: i32) -> (i32, i32) {
    %c0_i32 = arith.constant 0 : i32
    %c0_i32_0 = arith.constant 0 : i32
    %c0_i32_1 = arith.constant 0 : i32
    return %c0_i32, %c0_i32_0 : i32, i32
  }
  func.func @transform_3(%arg0: i32) -> (i32, i32) {
    %c0_i32 = arith.constant 0 : i32
    %c0_i32_0 = arith.constant 0 : i32
    %c0_i32_1 = arith.constant 0 : i32
    return %c0_i32, %c0_i32_0 : i32, i32
  }
  func.func @transform_4(%arg0: i32) -> (i32, i32) {
    %c0_i32 = arith.constant 0 : i32
    %c0_i32_0 = arith.constant 0 : i32
    %c0_i32_1 = arith.constant 0 : i32
    return %c0_i32, %c0_i32_0 : i32, i32
  }
  func.func @transform_5(%arg0: i32) -> (i32, i32) {
    %c0_i32 = arith.constant 0 : i32
    %c0_i32_0 = arith.constant 0 : i32
    %c0_i32_1 = arith.constant 0 : i32
    return %c0_i32, %c0_i32_0 : i32, i32
  }
  func.func @transform_6(%arg0: i32) -> (i32, i32) {
    %c0_i32 = arith.constant 0 : i32
    %c0_i32_0 = arith.constant 0 : i32
    %c0_i32_1 = arith.constant 0 : i32
    return %c0_i32, %c0_i32_0 : i32, i32
  }
  func.func @transform_7(%arg0: i32) -> (i32, i32) {
    %c0_i32 = arith.constant 0 : i32
    %c0_i32_0 = arith.constant 0 : i32
    %c0_i32_1 = arith.constant 0 : i32
    return %c0_i32, %c0_i32_0 : i32, i32
  }
  func.func @transform_8(%arg0: i32) -> (i32, i32) {
    %c0_i32 = arith.constant 0 : i32
    %c0_i32_0 = arith.constant 0 : i32
    %c0_i32_1 = arith.constant 0 : i32
    return %c0_i32, %c0_i32_0 : i32, i32
  }
  func.func @transform_9(%arg0: i32) -> (i32, i32) {
    %c0_i32 = arith.constant 0 : i32
    %c0_i32_0 = arith.constant 0 : i32
    return %arg0, %c0_i32 : i32, i32
  }
}

</mosaic_0001>

<bundles_post_ra>
// kernel: pro_dsc_forward.2
= control target key start
LH: loop header
LB: loop body
LE: loop exit
PB: predicated region body
PF: predicated region fallthrough
CT: control target
= control target key end

     0   :  { %10 = vsyncpa [#allocation3], 0  ;;  %s251_s18 = smov [#allocation2]   ;;  %s252_s20 = smov 64   ;;  %s294_s0 = inlined_call_operand.vmem [shape: bf16[16,128], index: 0, kind: input, shape index: {}]   ;;  %s295_s1 = inlined_call_operand.hbm [shape: bf16[128,128], index: 1, kind: input, shape index: {}]   ;;  %s296_s2 = inlined_call_operand.vmem [shape: f32[1,128], index: 2, kind: input, shape index: {}]   ;;  %s297_s3 = inlined_call_operand.vmem [shape: f32[8,128], index: 3, kind: output, shape index: {0}]   ;;  %s298_s4 = inlined_call_operand.vmem [shape: f32[8,128], index: 4, kind: output, shape index: {1}]  }
   0x1   :  { %s25_s17 = sshll.u32 %s295_s1, 4  ;;  %s27_s19 = sshll.u32 %s251_s18, 4  ;;  %s26_s17 = int_to_ptr.hbm [resolvable:$true] %s25_s17  ;;  %s28_s19 = int_to_ptr.vmem [resolvable:$true] %s27_s19 }
   0x2   :  { %s253_s21 = smov 4  }
   0x3   :  { %33 = dma.hbm_to_vmem [thread:$0]  %s26_s17, 1024, %s28_s19, [#allocation3], %s252_s20, %s252_s20, %s253_s21  }
   0x4   :  { %249 = dma.done.wait [#allocation3], 1024  }
   0x5   :  { %250 = vsyncadd [#allocation3], 4294966272  ;;  %v219_v0 = vld [vmem:[#allocation2 + $0x38] sm:$0xff]  ;;  %v218_v1 = vld [vmem:[#allocation2 + $0x30] sm:$0xff] }
   0x6   :  { %136 = vmatpush.bf16.msra.mxu0 %v219_v0  ;;  %v217_v2 = vld [vmem:[#allocation2 + $0x28] sm:$0xff]  ;;  %v216_v3 = vld [vmem:[#allocation2 + $0x20] sm:$0xff]  ;;  %v215_v4 = vld [vmem:[#allocation2 + $0x18] sm:$0xff] }
   0x7   :  { %v214_v5 = vld [vmem:[#allocation2 + $0x10] sm:$0xff]  ;;  %v213_v6 = vld [vmem:[#allocation2 + $0x8] sm:$0xff]  ;;  %v212_v7 = vld [vmem:[#allocation2] sm:$0xff] }
   0x8   :  { %v211_v8 = vld [vmem:[%s294_s0] sm:$0xff] }
   0x9   :  { %v224_v10 = vld [vmem:[%s296_s2] ss:$0 sm:$0xff] }
   0xa   :  { %137 = vmatpush.bf16.msra.mxu0 %v218_v1 }
   0xe   :  { %138 = vmatpush.bf16.msra.mxu0 %v217_v2 }
  0x12   :  { %139 = vmatpush.bf16.msra.mxu0 %v216_v3 }
  0x16   :  { %140 = vmatpush.bf16.msra.mxu0 %v215_v4 }
  0x1a   :  { %141 = vmatpush.bf16.msra.mxu0 %v214_v5 }
  0x1e   :  { %142 = vmatpush.bf16.msra.mxu0 %v213_v6 }
  0x22   :  { %143 = vmatpush.bf16.msra.mxu0 %v212_v7 }
  0x25   :  { %144 = vmatmul.bf16.vlgmr.msra.gmra.mxu0 %v211_v8 }
  0xa2   :  { %v145_v9 = vpop.f32.mrf.mxu0 }
  0xa3   :  { %v146_v11 = vadd.f32 %v224_v10, %v145_v9 }
  0xa5   :  { %v155_v14 = vmul.f32 %v146_v11, %v146_v11 }
  0xaa   :  { %v147_v12 = vpop.f32.mrf.mxu0 }
  0xab   :  { %v148_v13 = vadd.f32 %v224_v10, %v147_v12 }
  0xad   :  { %v151_v15 = vadd.f32 %v148_v13, %v146_v11  ;;  %v156_v16 = vmul.f32 %v148_v13, %v148_v13 }
  0xaf   :  { %v157_v17 = vadd.f32 %v156_v16, %v155_v14  ;;  %153 = vst [vmem:[%s297_s3] sm:$0xff] %v151_v15 }
  0xb1   :  { %159 = vst [vmem:[%s298_s4] sm:$0xff] %v157_v17 }
  0xb2   :  { %168 = vsyncpa [#allocation3], 1 }

// kernel: pro_dsc_forward.3
= control target key start
LH: loop header
LB: loop body
LE: loop exit
PB: predicated region body
PF: predicated region fallthrough
CT: control target
= control target key end

     0   :  { %14 = vsyncpa [#allocation3], 0  ;;  %s830_s0 = inlined_call_operand.vmem [shape: bf16[16,128], index: 0, kind: input, shape index: {}]   ;;  %s831_s1 = inlined_call_operand.hbm [shape: bf16[128,128], index: 1, kind: input, shape index: {}]   ;;  %s832_s2 = inlined_call_operand.vmem [shape: f32[1,128], index: 2, kind: input, shape index: {}]   ;;  %s833_s3 = inlined_call_operand.vmem [shape: f32[1,128], index: 3, kind: input, shape index: {}]   ;;  %s834_s4 = inlined_call_operand.vmem [shape: f32[1,128], index: 4, kind: input, shape index: {}]   ;;  %s835_s5 = inlined_call_operand.hbm [shape: bf16[128,128], index: 5, kind: input, shape index: {}]   ;;  %s836_s6 = inlined_call_operand.vmem [shape: f32[1,128], index: 6, kind: input, shape index: {}]   ;;  %s837_s7 = inlined_call_operand.hbm [shape: bf16[128,256], index: 7, kind: input, shape index: {}]   ;;  %s838_s8 = inlined_call_operand.vmem [shape: f32[1,256], index: 8, kind: input, shape index: {}]   ;;  %s839_s9 = inlined_call_operand.vmem [shape: f32[16,256], index: 9, kind: output, shape index: {}]  }
   0x1   :  { %15 = vsyncpa [#allocation5], 0  ;;  %s41_s11 = sshll.u32 %s835_s5, 4  ;;  %s729_s12 = smov [#allocation4]   ;;  %s42_s11 = int_to_ptr.hbm [resolvable:$true] %s41_s11 }
   0x2   :  { %s43_s13 = sshll.u32 %s729_s12, 4  ;;  %s22_s16 = sshll.u32 %s831_s1, 4  ;;  %s44_s13 = int_to_ptr.vmem [resolvable:$true] %s43_s13  ;;  %s23_s16 = int_to_ptr.hbm [resolvable:$true] %s22_s16 }
   0x3   :  { %s730_s17 = smov 64   ;;  %s731_s18 = smov 4  }
   0x4   :  { %49 = dma.hbm_to_vmem [thread:$0]  %s42_s11, 1024, %s44_s13, [#allocation5], %s730_s17, %s730_s17, %s731_s18  }
   0x5   :  { %s732_s19 = smov [#allocation2]   ;;  %s56_s23 = sshll.u32 %s837_s7, 4  ;;  %s57_s23 = int_to_ptr.hbm [resolvable:$true] %s56_s23 }
   0x6   :  { %s24_s20 = sshll.u32 %s732_s19, 4  ;;  %s733_s5 = smov [#allocation6]   ;;  %s25_s20 = int_to_ptr.vmem [resolvable:$true] %s24_s20 }
   0x7   :  { %30 = dma.hbm_to_vmem [thread:$0]  %s23_s16, 1024, %s25_s20, [#allocation3], %s730_s17, %s730_s17, %s731_s18  }
   0x8   :  { %s58_s24 = sshll.u32 %s733_s5, 4  ;;  %s734_s25 = smov 128   ;;  %s59_s24 = int_to_ptr.vmem [resolvable:$true] %s58_s24 }
   0x9   :  { %s735_s26 = smov 8  }
   0xa   :  { %64 = dma.hbm_to_vmem [thread:$0]  %s57_s23, 2048, %s59_s24, [#allocation5], %s734_s25, %s734_s25, %s735_s26  }
   0xb   :  { %725 = dma.done.wait [#allocation3], 1024  }
   0xc   :  { %726 = vsyncadd [#allocation3], 4294966272 }
   0xd   :  { %727 = dma.done.wait [#allocation5], 3072  }
   0xe   :  { %728 = vsyncadd [#allocation5], 4294964224  ;;  %v609_v0 = vld [vmem:[#allocation2 + $0x38] sm:$0xff]  ;;  %v608_v1 = vld [vmem:[#allocation2 + $0x30] sm:$0xff] }
   0xf   :  { %155 = vmatpush.bf16.msra.mxu0 %v609_v0  ;;  %v617_v2 = vld [vmem:[#allocation4 + $0x38] sm:$0xff]  ;;  %v616_v3 = vld [vmem:[#allocation4 + $0x30] sm:$0xff]  ;;  %v607_v4 = vld [vmem:[#allocation2 + $0x28] sm:$0xff] }
  0x10   :  { %252 = vmatpush.bf16.msra.mxu1 %v617_v2  ;;  %v615_v5 = vld [vmem:[#allocation4 + $0x28] sm:$0xff]  ;;  %v606_v6 = vld [vmem:[#allocation2 + $0x20] sm:$0xff]  ;;  %v605_v7 = vld [vmem:[#allocation2 + $0x18] sm:$0xff] }
  0x11   :  { %v604_v8 = vld [vmem:[#allocation2 + $0x10] sm:$0xff]  ;;  %v603_v9 = vld [vmem:[#allocation2 + $0x8] sm:$0xff]  ;;  %v602_v10 = vld [vmem:[#allocation2] sm:$0xff] }
  0x12   :  { %v601_v11 = vld [vmem:[%s830_s0] sm:$0xff]  ;;  %v613_v13 = vld [vmem:[#allocation4 + $0x18] sm:$0xff]  ;;  %v612_v14 = vld [vmem:[#allocation4 + $0x10] sm:$0xff] }
  0x13   :  { %156 = vmatpush.bf16.msra.mxu0 %v608_v1  ;;  %v614_v12 = vld [vmem:[#allocation4 + $0x20] sm:$0xff]  ;;  %v611_v15 = vld [vmem:[#allocation4 + $0x8] sm:$0xff]  ;;  %v595_v17 = vld [vmem:[#allocation6 + $0x70] sm:$0xf] }
  0x14   :  { %253 = vmatpush.bf16.msra.mxu1 %v616_v3  ;;  %v610_v16 = vld [vmem:[#allocation4] sm:$0xff]  ;;  %v633_v18 = vld [vmem:[#allocation6 + $0x74] sm:$0xf0]  ;;  %v632_v19 = vld [vmem:[#allocation6 + $0x74] sm:$0xf] }
  0x15   :  { %v596_v20 = vor.u32 %v633_v18, %v595_v17  ;;  %v597_v21 = vld [vmem:[#allocation6 + $0x78] sm:$0xf0]  ;;  %v587_v22 = vld [vmem:[#allocation6 + $0x60] sm:$0xf]  ;;  %v631_v23 = vld [vmem:[#allocation6 + $0x64] sm:$0xf0] }
  0x16   :  { %v600_v24 = vor.u32 %v632_v19, %v597_v21  ;;  %v630_v25 = vld [vmem:[#allocation6 + $0x64] sm:$0xf]  ;;  %v589_v26 = vld [vmem:[#allocation6 + $0x68] sm:$0xf0]  ;;  %v588_v27 = vor.u32 %v631_v23, %v587_v22  ;;  %v579_v29 = vld [vmem:[#allocation6 + $0x50] sm:$0xf] }
  0x17   :  { %157 = vmatpush.bf16.msra.mxu0 %v607_v4  ;;  %371 = vmatpush.bf16.msra.mxu2 %v596_v20  ;;  %v592_v28 = vor.u32 %v630_v25, %v589_v26  ;;  %v629_v30 = vld [vmem:[#allocation6 + $0x54] sm:$0xf0]  ;;  %v628_v31 = vld [vmem:[#allocation6 + $0x54] sm:$0xf]  ;;  %v581_v32 = vld [vmem:[#allocation6 + $0x58] sm:$0xf0] }
  0x18   :  { %254 = vmatpush.bf16.msra.mxu1 %v615_v5  ;;  %385 = vmatpush.bf16.msra.mxu3 %v600_v24  ;;  %v580_v33 = vor.u32 %v629_v30, %v579_v29  ;;  %v584_v34 = vor.u32 %v628_v31, %v581_v32  ;;  %v571_v35 = vld [vmem:[#allocation6 + $0x40] sm:$0xf]  ;;  %v627_v36 = vld [vmem:[#allocation6 + $0x44] sm:$0xf0]  ;;  %v626_v37 = vld [vmem:[#allocation6 + $0x44] sm:$0xf] }
  0x19   :  { %v573_v38 = vld [vmem:[#allocation6 + $0x48] sm:$0xf0]  ;;  %v572_v39 = vor.u32 %v627_v36, %v571_v35  ;;  %v641_v40 = vld [vmem:[%s832_s2] ss:$0 sm:$0xff]  ;;  %v563_v55 = vld [vmem:[#allocation6 + $0x30] sm:$0xf] }
  0x1a   :  { %v576_v41 = vor.u32 %v626_v37, %v573_v38  ;;  %v642_v44 = vld [vmem:[%s833_s3] ss:$0 sm:$0xff]  ;;  %v625_v56 = vld [vmem:[#allocation6 + $0x34] sm:$0xf0]  ;;  %v624_v57 = vld [vmem:[#allocation6 + $0x34] sm:$0xf] }
  0x1b   :  { %158 = vmatpush.bf16.msra.mxu0 %v606_v6  ;;  %372 = vmatpush.bf16.msra.mxu2 %v588_v27  ;;  %v643_v46 = vld [vmem:[%s834_s4] ss:$0 sm:$0xff]  ;;  %v564_v58 = vor.u32 %v625_v56, %v563_v55  ;;  %v565_v59 = vld [vmem:[#allocation6 + $0x38] sm:$0xf0]  ;;  %v623_v62 = vld [vmem:[#allocation6 + $0x24] sm:$0xf0] }
  0x1c   :  { %255 = vmatpush.bf16.msra.mxu1 %v614_v12  ;;  %386 = vmatpush.bf16.msra.mxu3 %v592_v28  ;;  %v568_v60 = vor.u32 %v624_v57, %v565_v59  ;;  %v555_v61 = vld [vmem:[#allocation6 + $0x20] sm:$0xf]  ;;  %v622_v63 = vld [vmem:[#allocation6 + $0x24] sm:$0xf]  ;;  %v557_v1 = vld [vmem:[#allocation6 + $0x28] sm:$0xf0] }
  0x1d   :  { %v556_v0 = vor.u32 %v623_v62, %v555_v61  ;;  %v560_v2 = vor.u32 %v622_v63, %v557_v1  ;;  %v547_v3 = vld [vmem:[#allocation6 + $0x10] sm:$0xf]  ;;  %v621_v4 = vld [vmem:[#allocation6 + $0x14] sm:$0xf0]  ;;  %v620_v5 = vld [vmem:[#allocation6 + $0x14] sm:$0xf] }
  0x1e   :  { %v548_v6 = vor.u32 %v621_v4, %v547_v3  ;;  %v285_v23 = vld [vmem:[%s838_s8] sm:$0x3] }
  0x1f   :  { %159 = vmatpush.bf16.msra.mxu0 %v605_v7  ;;  %373 = vmatpush.bf16.msra.mxu2 %v580_v33  ;;  %v549_v7 = vld [vmem:[#allocation6 + $0x18] sm:$0xf0]  ;;  %v287_v24 = vperm.slane %v285_v23, 0  ;;  %v288_v25 = vperm.slane %v285_v23, 1 }
  0x20   :  { %256 = vmatpush.bf16.msra.mxu1 %v613_v13  ;;  %387 = vmatpush.bf16.msra.mxu3 %v584_v34  ;;  %v541_v13 = vld [vmem:[#allocation6 + $0x8] sm:$0xf0] }
  0x23   :  { %160 = vmatpush.bf16.msra.mxu0 %v604_v8  ;;  %374 = vmatpush.bf16.msra.mxu2 %v572_v39  ;;  %v552_v8 = vor.u32 %v620_v5, %v549_v7 }
  0x24   :  { %257 = vmatpush.bf16.msra.mxu1 %v612_v14  ;;  %388 = vmatpush.bf16.msra.mxu3 %v576_v41 }
  0x27   :  { %161 = vmatpush.bf16.msra.mxu0 %v603_v9  ;;  %375 = vmatpush.bf16.msra.mxu2 %v564_v58  ;;  %v539_v9 = vld [vmem:[#allocation6] sm:$0xf] }
  0x28   :  { %258 = vmatpush.bf16.msra.mxu1 %v611_v15  ;;  %389 = vmatpush.bf16.msra.mxu3 %v568_v60 }
  0x2b   :  { %162 = vmatpush.bf16.msra.mxu0 %v602_v10  ;;  %376 = vmatpush.bf16.msra.mxu2 %v556_v0  ;;  %v619_v10 = vld [vmem:[#allocation6 + $0x4] sm:$0xf0] }
  0x2c   :  { %259 = vmatpush.bf16.msra.mxu1 %v610_v16  ;;  %390 = vmatpush.bf16.msra.mxu3 %v560_v2  ;;  %v540_v12 = vor.u32 %v619_v10, %v539_v9  ;;  %v644_v16 = vld [vmem:[%s836_s6] ss:$0 sm:$0xff] }
  0x2e   :  { %163 = vmatmul.bf16.vlgmr.msra.gmra.mxu0 %v601_v11  ;;  %v618_v11 = vld [vmem:[#allocation6 + $0x4] sm:$0xf] }
  0x2f   :  { %377 = vmatpush.bf16.msra.mxu2 %v548_v6  ;;  %v544_v14 = vor.u32 %v618_v11, %v541_v13 }
  0x30   :  { %391 = vmatpush.bf16.msra.mxu3 %v552_v8 }
  0x33   :  { %378 = vmatpush.bf16.msra.mxu2 %v540_v12 }
  0x34   :  { %392 = vmatpush.bf16.msra.mxu3 %v544_v14 }
  0xab   :  { %v164_v42 = vpop.f32.mrf.mxu0 }
  0xac   :  { %v165_v43 = vadd.f32 %v641_v40, %v164_v42 }
  0xae   :  { %v173_v45 = vmul.f32 %v642_v44, %v165_v43 }
  0xb0   :  { %v179_v50 = vadd.f32 %v643_v46, %v173_v45 }
  0xb2   :  { %v181_v52 = vmax.f32 %v179_v50, 0.0 }
  0xb3   :  { %v166_v47 = vpop.f32.mrf.mxu0 }
  0xb4   :  { %v167_v48 = vadd.f32 %v641_v40, %v166_v47 }
  0xb6   :  { %v174_v49 = vmul.f32 %v642_v44, %v167_v48 }
  0xb8   :  { %v180_v51 = vadd.f32 %v643_v46, %v174_v49 }
  0xba   :  { %v182_v53 = vmax.f32 %v180_v51, 0.0 }
  0xbc   :  { %v183_v54 = vpack.c.bf16 %v182_v53, %v181_v52 }
  0xbe   :  { %260 = vmatmul.bf16.vlgmr.msra.gmra.mxu1 %v183_v54 }
 0x13b   :  { %v261_v15 = vpop.f32.mrf.mxu1 }
 0x13c   :  { %v262_v17 = vadd.f32 %v644_v16, %v261_v15 }
 0x13e   :  { %v266_v20 = vmax.f32 %v262_v17, 0.0 }
 0x143   :  { %v263_v18 = vpop.f32.mrf.mxu1 }
 0x144   :  { %v264_v19 = vadd.f32 %v644_v16, %v263_v18 }
 0x146   :  { %v267_v21 = vmax.f32 %v264_v19, 0.0 }
 0x148   :  { %v268_v22 = vpack.c.bf16 %v267_v21, %v266_v20 }
 0x14a   :  { %379 = vmatmul.bf16.vlgmr.msra.gmra.mxu2 %v268_v22  ;;  %393 = vmatmul.bf16.vlgmr.msra.gmra.mxu3 %v268_v22 }
 0x1cd   :  { %v380_v26 = vpop.f32.mrf.mxu2  ;;  %v394_v27 = vpop.f32.mrf.mxu3 }
 0x1ce   :  { %v381_v28 = vadd.f32 %v380_v26, %v287_v24  ;;  %v395_v29 = vadd.f32 %v394_v27, %v288_v25 }
 0x1d0   :  { %v427_v30 = vmul.f32 %v395_v29, %v395_v29  ;;  %v399_v31 = vmul.f32 %v381_v28, %v381_v28 }
 0x1d2   :  { %429 = vadd.xlane.f32.xlu1 %v427_v30  ;;  %401 = vadd.xlane.f32.xlu0 %v399_v31 }
 0x1d5   :  { %v382_v32 = vpop.f32.mrf.mxu2  ;;  %v396_v33 = vpop.f32.mrf.mxu3 }
 0x1d6   :  { %v813_v34 = vadd.f32 %v382_v32, %v287_v24  ;;  %v397_v35 = vadd.f32 %v396_v33, %v288_v25 }
 0x1d8   :  { %v428_v36 = vmul.f32 %v397_v35, %v397_v35  ;;  %v400_v37 = vmul.f32 %v813_v34, %v813_v34 }
 0x1da   :  { %431 = vadd.xlane.f32.xlu1 %v428_v36  ;;  %403 = vadd.xlane.f32.xlu0 %v400_v37 }
 0x245   :  { %v430_v38 = vpop.xlane.xlu1 %429  ;;  %v402_v39 = vpop.xlane.xlu0 %401 }
 0x246   :  { %v433_v40 = vmax.f32 %v430_v38, 1e-24  ;;  %v405_v41 = vmax.f32 %v402_v39, 1e-24 }
 0x248   :  { %645 = vrsqrt.f32 %v433_v40  ;;  %vm441_vm2 = vweird.f32 %v433_v40  ;;  %vm413_vm4 = vweird.f32 %v405_v41 }
 0x249   :  { %647 = vrsqrt.f32 %v405_v41 }
 0x24d   :  { %v432_v42 = vpop.xlane.xlu1 %431  ;;  %v404_v43 = vpop.xlane.xlu0 %403 }
 0x24e   :  { %v646_v44 = vpop.eup %645  ;;  %v434_v45 = vmax.f32 %v432_v42, 1e-24  ;;  %v406_v46 = vmax.f32 %v404_v43, 1e-24 }
 0x24f   :  { %v648_v47 = vpop.eup %647  ;;  %v436_v48 = vmul.f32 %v646_v44, %v433_v40  ;;  %vm442_vm0 = vweird.f32 %v646_v44 }
 0x250   :  { %v408_v49 = vmul.f32 %v648_v47, %v405_v41  ;;  %649 = vrsqrt.f32 %v434_v45  ;;  %vm414_vm1 = vweird.f32 %v648_v47  ;;  %vm443_vm3 = vmor %vm441_vm2, %vm442_vm0  ;;  %vm451_vm8 = vweird.f32 %v434_v45 }
 0x251   :  { %v437_v50 = vmul.f32 %v646_v44, %v436_v48  ;;  %651 = vrsqrt.f32 %v406_v46  ;;  %vm415_vm5 = vmor %vm413_vm4, %vm414_vm1  ;;  %vm423_vm10 = vweird.f32 %v406_v46 }
 0x252   :  { %v409_v51 = vmul.f32 %v648_v47, %v408_v49 }
 0x253   :  { %v438_v52 = vmul.f32 0.5, %v437_v50 }
 0x254   :  { %v410_v53 = vmul.f32 0.5, %v409_v51 }
 0x255   :  { %v439_v54 = vsub.f32 1.5, %v438_v52 }
 0x256   :  { %v650_v55 = vpop.eup %649  ;;  %v411_v56 = vsub.f32 1.5, %v410_v53 }
 0x257   :  { %v652_v57 = vpop.eup %651  ;;  %v440_v58 = vmul.f32 %v646_v44, %v439_v54  ;;  %v446_v59 = vmul.f32 %v650_v55, %v434_v45  ;;  %vm452_vm6 = vweird.f32 %v650_v55 }
 0x258   :  { %v412_v60 = vmul.f32 %v648_v47, %v411_v56  ;;  %v418_v61 = vmul.f32 %v652_v57, %v406_v46  ;;  %vm424_vm7 = vweird.f32 %v652_v57  ;;  %vm453_vm9 = vmor %vm451_vm8, %vm452_vm6 }
 0x259   :  { %v444_v62 = vsel %vm443_vm3, %v646_v44, %v440_v58  ;;  %v447_v63 = vmul.f32 %v650_v55, %v446_v59  ;;  %vm425_vm11 = vmor %vm423_vm10, %vm424_vm7 }
 0x25a   :  { %v459_v0 = vmul.f32 %v444_v62, %v395_v29  ;;  %v416_v1 = vsel %vm415_vm5, %v648_v47, %v412_v60  ;;  %v419_v2 = vmul.f32 %v652_v57, %v418_v61 }
 0x25b   :  { %v455_v3 = vmul.f32 %v416_v1, %v381_v28  ;;  %v448_v4 = vmul.f32 0.5, %v447_v63 }
 0x25c   :  { %461 = vst [vmem:[%s839_s9 + $0x8] sm:$0xff] %v459_v0  ;;  %v420_v5 = vmul.f32 0.5, %v419_v2 }
 0x25d   :  { %457 = vst [vmem:[%s839_s9] sm:$0xff] %v455_v3  ;;  %v449_v6 = vsub.f32 1.5, %v448_v4 }
 0x25e   :  { %v421_v7 = vsub.f32 1.5, %v420_v5 }
 0x25f   :  { %v450_v8 = vmul.f32 %v650_v55, %v449_v6 }
 0x260   :  { %v422_v9 = vmul.f32 %v652_v57, %v421_v7 }
 0x261   :  { %v454_v10 = vsel %vm453_vm9, %v650_v55, %v450_v8 }
 0x262   :  { %v460_v11 = vmul.f32 %v454_v10, %v397_v35  ;;  %v426_v12 = vsel %vm425_vm11, %v652_v57, %v422_v9 }
 0x263   :  { %v456_v13 = vmul.f32 %v426_v12, %v813_v34 }
 0x264   :  { %462 = vst [vmem:[%s839_s9 + $0x18] sm:$0xff] %v460_v11 }
 0x265   :  { %458 = vst [vmem:[%s839_s9 + $0x10] sm:$0xff] %v456_v13 }
 0x266   :  { %467 = vsyncpa [#allocation3], 1 }
 0x267   :  { %468 = vsyncpa [#allocation5], 1 }

</bundles_post_ra>
